<compile_context>
chip_gen: v7x
topology: tpu7x:2x2x1
jax: 0.10.0
libtpu: 0.0.40
codegen_flags: <defaults>
</compile_context>

<pallas_src>
import functools
import math

import jax
import jax.numpy as jnp
from jax.experimental import pallas as pl
from jax.experimental.pallas import tpu as pltpu


def make_positional_encoding_table(d, l, dtype=jnp.float32):
    """Replicates the PyTorch __init__ buffer:  pe with shape [1, l, d]."""
    position = jnp.arange(l, dtype=jnp.float32)[:, None]                 # [l, 1]
    div_term = jnp.exp(jnp.arange(0, d, 2, dtype=jnp.float32)
                       * (-math.log(10000.0) / d))                       # [d//2]
    pe = jnp.zeros((l, d), jnp.float32)
    pe = pe.at[:, 0::2].set(jnp.sin(position * div_term))
    pe = pe.at[:, 1::2].set(jnp.cos(position * div_term))
    return pe[None].astype(dtype)                                        # [1, l, d]


def _pos_enc_kernel(x_ref, pe_ref, o_ref, *, f_dim, split_store):
    # x_ref: (tb, tl, F)   pe_ref: (1, tl, D)   o_ref: (tb, tl, F + D)
    x = x_ref[...]
    pe = jnp.broadcast_to(pe_ref[...],
                          (x.shape[0], x.shape[1], pe_ref.shape[-1]))
    if split_store:
        # F and F+D are 128-aligned: two plain unmasked lane-dense stores,
        # no cross-lane concatenate work.
        o_ref[:, :, :f_dim] = x
        o_ref[:, :, f_dim:] = pe
    else:
        # Unaligned feature widths (e.g. the demo): register-level concat.
        o_ref[...] = jnp.concatenate([x, pe], axis=-1)


def _vmem_budget_bytes():
    """(tile working-set budget, scoped vmem limit) for this TPU generation."""
    cap = 64 << 20  # conservative fallback = v7x physical VMEM per TC
    try:
        info = pltpu.get_tpu_info()
        cap = int(getattr(info, "vmem_capacity_bytes", cap))
    except Exception:
        pass
    # Use at most half the physical VMEM as the scoped limit and a quarter as
    # the double-buffered tile budget (leaves compiler headroom on every gen:
    # v5e/v6e 128 MiB -> 32 MiB budget, v7x 64 MiB -> 16 MiB budget).
    return cap // 4, cap // 2


def _choose_tiles(B, L, F, D, itemsize, budget):
    """Pick (tb, tl) so the double-buffered footprint stays under `budget`."""
    row_out = F + D

    def footprint(tb, tl):
        # x tile + pe tile + out tile, each double-buffered by the pipeline.
        return 2 * itemsize * (tb * tl * F + tl * D + tb * tl * row_out)

    # Time tile: full L when it fits with tb = 1, otherwise the largest
    # multiple of 8 that does (second-to-last block dim must be 8-aligned
    # unless it equals the full dim).
    if L <= 8 or footprint(1, L) <= budget:
        tl = L
    else:
        per_row = 2 * itemsize * (F + D + row_out)
        tl = max(8, (budget // per_row) // 8 * 8)
        tl = int(min(tl, (L // 8) * 8))

    # Batch tile: as many batch rows as still fit in the budget.
    avail = budget // (2 * itemsize) - tl * D
    if avail > 0:
        tb = max(1, avail // (tl * (F + row_out)))
    else:
        tb = 1
    tb = int(min(tb, B))
    return tb, tl


def positional_encoding_forward(x, pe):
    """out[b, t, :] = concat(x[b, t, :], pe[0, t, :])  — the module forward."""
    B, L, F = x.shape
    _, Lp, D = pe.shape
    assert Lp == L, "time dimension of x must match the pe buffer length"

    # Cast the buffer once here (plain JAX, amortized) so the kernel does no
    # per-tile cast and pe HBM traffic is in the model dtype.
    if pe.dtype != x.dtype:
        pe = pe.astype(x.dtype)

    itemsize = jnp.dtype(x.dtype).itemsize
    budget, vmem_limit = _vmem_budget_bytes()
    tb, tl = _choose_tiles(B, L, F, D, itemsize, budget)
    nt = pl.cdiv(L, tl)   # ragged time tail handled by Pallas block clipping
    nb = pl.cdiv(B, tb)   # ragged batch tail likewise

    split_store = (F % 128 == 0) and (D % 128 == 0)
    kernel = functools.partial(_pos_enc_kernel, f_dim=F, split_store=split_store)

    out_shape = jax.ShapeDtypeStruct((B, L, F + D), x.dtype)
    # pe is fetched once per time tile (constant block index across the inner
    # batch axis -> re-DMA skipped), so its traffic is ~L*D, not B*L*D.
    bytes_accessed = (itemsize * B * L * F          # x read
                      + itemsize * L * D            # pe read (once)
                      + itemsize * B * L * (F + D)) # out write

    return pl.pallas_call(
        kernel,
        out_shape=out_shape,
        grid_spec=pltpu.PrefetchScalarGridSpec(
            num_scalar_prefetch=0,
            # Time OUTER, batch INNER: pe block index unchanged across the
            # inner loop -> Pallas skips re-fetching it from HBM.
            grid=(nt, nb),
            in_specs=[
                # x tile: contiguous (tb, tl, F) slab.
                pl.BlockSpec((tb, tl, F), lambda t, b: (b, t, 0)),
                # pe tile: broadcast over batch (block index ignores b).
                pl.BlockSpec((1, tl, D), lambda t, b: (0, t, 0)),
            ],
            out_specs=pl.BlockSpec((tb, tl, F + D), lambda t, b: (b, t, 0)),
        ),
        compiler_params=pltpu.CompilerParams(
            # Both axes independent -> shard across TensorCores on megacore.
            dimension_semantics=("parallel", "parallel"),
            vmem_limit_bytes=vmem_limit),
        cost_estimate=pl.CostEstimate(
            flops=0, transcendentals=0, bytes_accessed=bytes_accessed),
    )(x, pe)


if __name__ == "__main__":
    # Small shapes consistent with the module: batch=2, seq(=l)=8, features=32,
    # positional-encoding width d=32  ->  output features = 64.
    batch, seq, features = 2, 8, 32
    d_pe = 32

    key = jax.random.PRNGKey(0)
    x = jax.random.normal(key, (batch, seq, features), jnp.float32)

    # Build pe directly in the model dtype (matches the wrapper's expectation).
    pe = make_positional_encoding_table(d_pe, seq, dtype=x.dtype)   # [1, seq, d_pe]

    out = positional_encoding_forward(x, pe)
    jax.block_until_ready(out)

    # Pure-JAX reference of the PyTorch forward (against the same-dtype table).
    ref = jnp.concatenate(
        [x, jnp.broadcast_to(pe.astype(x.dtype), (batch, seq, d_pe))], axis=2)
    assert out.shape == (batch, seq, features + d_pe)
    assert jnp.allclose(out, ref, atol=1e-6, rtol=1e-6), "mismatch vs reference"

    print("KERNEL_OK")
</pallas_src>

<mosaic_0001>
module attributes {stable_mosaic.version = 11 : i64} {
  func.func @_pos_enc_kernel(%arg0: i32, %arg1: i32, %arg2: memref<2x8x32xf32, #tpu.memory_space<vmem>>, %arg3: memref<1x8x32xf32, #tpu.memory_space<vmem>>, %arg4: memref<2x8x64xf32, #tpu.memory_space<vmem>>) attributes {dimension_semantics = [#tpu.dimension_semantics<parallel>, #tpu.dimension_semantics<parallel>], iteration_bounds = array<i64: 1, 1>, scalar_prefetch = 0 : i64, scratch_operands = 0 : i64, tpu.core_type = #tpu.core_type<tc>, window_params = [{transform_indices = @transform_0, window_bounds = array<i64: 2, 8, 32>}, {transform_indices = @transform_1, window_bounds = array<i64: 1, 8, 32>}, {transform_indices = @transform_2, window_bounds = array<i64: 2, 8, 64>}]} {
    %c0 = arith.constant 0 : index
    %c0_0 = arith.constant 0 : index
    %c0_1 = arith.constant 0 : index
    %0 = vector.load %arg2[%c0, %c0_0, %c0_1] : memref<2x8x32xf32, #tpu.memory_space<vmem>>, vector<2x8x32xf32>
    %c0_2 = arith.constant 0 : index
    %c0_3 = arith.constant 0 : index
    %c0_4 = arith.constant 0 : index
    %1 = vector.load %arg3[%c0_2, %c0_3, %c0_4] : memref<1x8x32xf32, #tpu.memory_space<vmem>>, vector<1x8x32xf32>
    %2 = vector.shape_cast %1 : vector<1x8x32xf32> to vector<1x8x32xf32>
    %3 = vector.broadcast %2 : vector<1x8x32xf32> to vector<2x8x32xf32>
    %4 = tpu.concatenate %0, %3 in 2 : vector<2x8x32xf32>, vector<2x8x32xf32> -> vector<2x8x64xf32>
    %c0_5 = arith.constant 0 : index
    %c0_6 = arith.constant 0 : index
    %c0_7 = arith.constant 0 : index
    %5 = vector.load %arg4[%c0_5, %c0_6, %c0_7] : memref<2x8x64xf32, #tpu.memory_space<vmem>>, vector<2x8x64xf32>
    tpu.vector_store %arg4[%c0_5, %c0_6, %c0_7], %4 {strides = array<i32>} : memref<2x8x64xf32, #tpu.memory_space<vmem>>, vector<2x8x64xf32>,
    return
  }
  func.func @transform_0(%arg0: i32, %arg1: i32) -> (i32, i32, i32) {
    %c0_i32 = arith.constant 0 : i32
    %c0_i32_0 = arith.constant 0 : i32
    return %arg1, %arg0, %c0_i32 : i32, i32, i32
  }
  func.func @transform_1(%arg0: i32, %arg1: i32) -> (i32, i32, i32) {
    %c0_i32 = arith.constant 0 : i32
    %c0_i32_0 = arith.constant 0 : i32
    %c0_i32_1 = arith.constant 0 : i32
    return %c0_i32, %arg0, %c0_i32_0 : i32, i32, i32
  }
  func.func @transform_2(%arg0: i32, %arg1: i32) -> (i32, i32, i32) {
    %c0_i32 = arith.constant 0 : i32
    %c0_i32_0 = arith.constant 0 : i32
    return %arg1, %arg0, %c0_i32 : i32, i32, i32
  }
}

</mosaic_0001>

<bundles_post_ra>
// kernel: tpu_custom_call.1
= control target key start
LH: loop header
LB: loop body
LE: loop exit
PB: predicated region body
PF: predicated region fallthrough
CT: control target
= control target key end

     0   :  { %7 = vsyncpa [#allocation3], 0  ;;  %s210_s0 = inlined_call_operand.hbm [shape: f32[2,8,32], index: 0, kind: input, shape index: {}]   ;;  %s211_s1 = inlined_call_operand.hbm [shape: f32[1,8,32], index: 1, kind: input, shape index: {}]   ;;  %s212_s2 = inlined_call_operand.hbm [shape: f32[2,8,64], index: 2, kind: output, shape index: {}]  }
   0x1   :  { %8 = vsyncpa [#allocation6], 0 }
   0x2   :  { %9 = vsyncpa [#allocation4], 0  ;;  %s147_s9 = smov [#allocation2]   ;;  %s75_s13 = scalar_lea.hbm %s210_s0, 256 }
   0x3   :  { %s15_s10 = sshll.u32 %s147_s9, 4  ;;  %p76_p0 = scmp.ne.s32.totalorder %s210_s0, %s75_s13  ;;  %s16_s10 = int_to_ptr.vmem [resolvable:$true] %s15_s10 }
   0x4   :  { %p79_p1 = scmp.lt.u32.totalorder %s75_s13, %s210_s0 }
   0x6   :  { %p81_p2 = pnand %p79_p1, %p76_p0 }
   0x8   :  { %84 = shalt.err (!%p81_p2)
}
   0x9   :  { %s85_s18 = scalar_lea.vmem %s16_s10, 256  ;;  %p90_p4 = scmp.lt.s32.totalorder %s16_s10, %s16_s10 }
   0xa   :  { %p86_p3 = scmp.ne.s32.totalorder %s16_s10, %s85_s18  ;;  %p91_p5 = scmp.lt.s32.totalorder %s85_s18, %s85_s18 }
   0xc   :  { %p92_p6 = por %p91_p5, %p90_p4 }
   0xe   :  { %p93_p7 = pnand %p92_p6, %p86_p3 }
  0x10   :  { %96 = shalt.err (!%p93_p7)
}
  0x11   :  { %s148_s19 = smov 128   ;;  %s149_s20 = smov 8  }
  0x12   :  { %21 = dma.hbm_to_vmem [thread:$0]  %s210_s0, 256, %s16_s10, [#allocation3], %s148_s19, %s148_s19, %s149_s20  }
  0x13   :  { %s150_s23 = smov [#allocation5]   ;;  %s97_s27 = scalar_lea.hbm %s211_s1, 128 }
  0x14   :  { %s28_s24 = sshll.u32 %s150_s23, 4  ;;  %p98_p8 = scmp.ne.s32.totalorder %s211_s1, %s97_s27  ;;  %s29_s24 = int_to_ptr.vmem [resolvable:$true] %s28_s24 }
  0x15   :  { %p101_p9 = scmp.lt.u32.totalorder %s97_s27, %s211_s1 }
  0x17   :  { %p103_p10 = pnand %p101_p9, %p98_p8 }
  0x19   :  { %106 = shalt.err (!%p103_p10)
}
  0x1a   :  { %s107_s4 = scalar_lea.vmem %s29_s24, 128  ;;  %p112_p12 = scmp.lt.s32.totalorder %s29_s24, %s29_s24 }
  0x1b   :  { %p108_p11 = scmp.ne.s32.totalorder %s29_s24, %s107_s4  ;;  %p113_p13 = scmp.lt.s32.totalorder %s107_s4, %s107_s4 }
  0x1d   :  { %p114_p0 = por %p113_p13, %p112_p12 }
  0x1f   :  { %p115_p1 = pnand %p114_p0, %p108_p11 }
  0x21   :  { %118 = shalt.err (!%p115_p1)
}
  0x22   :  { %31 = dma.hbm_to_vmem [thread:$0]  %s211_s1, 128, %s29_s24, [#allocation6]  }
  0x23   :  { %141 = dma.done.wait [#allocation3], 256  }
  0x24   :  { %142 = vsyncadd [#allocation3], 4294967040 }
  0x25   :  { %143 = dma.done.wait [#allocation6], 128  }
  0x26   :  { %144 = vsyncadd [#allocation6], 4294967168  ;;  %v40_v0 = vld [vmem:[#allocation5] sm:$0xff]  ;;  %s151_s6 = smov 32   ;;  %s152_s7 = smov [#allocation7]   ;;  %v38_v1 = vld [vmem:[#allocation2] sm:$0xff] }
  0x27   :  { %42 = vrot.lane.b32.xlu0 %v40_v0, %s151_s6  ;;  %s56_s8 = sshll.u32 %s152_s7, 4  ;;  %v39_v2 = vld [vmem:[#allocation2 + $0x8] sm:$0xff]  ;;  %vm45_vm0 = vcmask 261120   ;;  %vm48_vm1 = vcmask 523264   ;;  %s57_s8 = int_to_ptr.vmem [resolvable:$true] %s56_s8 }
  0x28   :  { %s119_s1 = scalar_lea.vmem %s57_s8, 256  ;;  %p124_p3 = scmp.lt.s32.totalorder %s57_s8, %s57_s8 }
  0x29   :  { %p120_p2 = scmp.ne.s32.totalorder %s57_s8, %s119_s1  ;;  %p125_p4 = scmp.lt.s32.totalorder %s119_s1, %s119_s1 }
  0x2b   :  { %p126_p5 = por %p125_p4, %p124_p3 }
  0x2d   :  { %p127_p6 = pnand %p126_p5, %p120_p2 }
  0x99   :  { %v43_v3 = vpop.permute.xlu0 %42 }
  0x9a   :  { %v46_v4 = vsel %vm45_vm0, %v38_v1, %v43_v3  ;;  %v47_v5 = vsel %vm45_vm0, %v39_v2, %v43_v3 }
  0x9b   :  { %49 = vst.msk [vmem:[#allocation7] sm:$0xff] %vm48_vm1, %v46_v4  ;;  %50 = vst.msk [vmem:[#allocation7 + $0x8] sm:$0xff] %vm48_vm1, %v47_v5 }
  0x9c   :  { %130 = shalt.err (!%p127_p6)
}
  0x9d   :  { %s131_s11 = scalar_lea.hbm %s212_s2, 256 }
  0x9e   :  { %p132_p7 = scmp.ne.s32.totalorder %s212_s2, %s131_s11  ;;  %p135_p8 = scmp.lt.u32.totalorder %s131_s11, %s212_s2 }
  0xa0   :  { %p137_p9 = pnand %p135_p8, %p132_p7 }
  0xa2   :  { %140 = shalt.err (!%p137_p9)
}
  0xa3   :  { %62 = dma.vmem_to_hbm [thread:$0]  %s57_s8, 256, %s212_s2, [#allocation4], %s148_s19, %s148_s19, %s149_s20  }
  0xa4   :  { %145 = dma.done.wait [#allocation4], 256  }
  0xa5   :  { %146 = vsyncadd [#allocation4], 4294967040 }
  0xa6   :  { %66 = vsyncpa [#allocation3], 1 }
  0xa7   :  { %67 = vsyncpa [#allocation6], 1 }
  0xa8   :  { %68 = vsyncpa [#allocation4], 1 }

</bundles_post_ra>
